<compile_context>
chip_gen: v7x
topology: tpu7x:2x2x1
jax: 0.10.0
libtpu: 0.0.40
codegen_flags: <defaults>
</compile_context>

<pallas_src>
import functools

import jax
import jax.numpy as jnp
from jax.experimental import pallas as pl
from jax.experimental.pallas import tpu as pltpu


# ------------------------------ helpers -------------------------------------

def _round_up(x, m):
    return (x + m - 1) // m * m


def _pick_tile(dim_pad, cap):
    """Largest multiple-of-128 tile <= cap that divides dim_pad (dim_pad % 128 == 0)."""
    if dim_pad <= cap:
        return dim_pad
    t = (cap // 128) * 128
    while t > 128 and dim_pad % t != 0:
        t -= 128
    return max(t, 128)


def _apply_activation(y, activation):
    if activation == "relu":
        return jnp.maximum(y, 0.0)
    elif activation == "leaky-relu":
        return jnp.where(y > 0, y, 0.01 * y)
    elif activation == "sigmoid":
        return jax.nn.sigmoid(y)
    elif activation is None:
        return y
    raise ValueError(f"unknown activation fuction {activation}")


def _vmem_budget_bytes():
    """Usable per-core VMEM budget (75% of physical), with a v7x-safe fallback."""
    try:
        cap = int(pltpu.get_tpu_info().vmem_capacity_bytes)
    except Exception:
        cap = 64 * 1024 * 1024  # conservative: v7x per-TensorCore VMEM
    return int(cap * 0.75)


# ----------------------------- Pallas kernels --------------------------------

def _fused_mlp_kernel(x_ref, *refs, n_layers, activation, residual_flags):
    """Full MLP forward for one batch tile; activations never leave VMEM/vregs.

    refs = (w0, b0, w1, b1, ..., w_{L-1}, b_{L-1}, o_ref)
    Weights: bf16, zero-padded, lane-dense, resident (single-buffered) in VMEM.
    Biases:  f32.  Accumulation / bias / activation / residual are f32; the
    inter-layer carry is downcast once to bf16 (feeds the next MXU matmul).
    """
    o_ref = refs[2 * n_layers]
    h = x_ref[...]                                   # bf16 (tm, K_pad)

    for i in range(n_layers):
        w = refs[2 * i][...]                         # bf16 (Kp, Np)
        b = refs[2 * i + 1][...]                     # f32  (1, Np)
        y = jnp.dot(h, w, preferred_element_type=jnp.float32) + b
        if i < n_layers - 1:                         # hidden layer
            y = _apply_activation(y, activation)
            if residual_flags[i]:                    # padded dims match too
                y = y + h.astype(jnp.float32)
            h = y.astype(jnp.bfloat16)               # bf16 carry to next layer
        else:                                        # final layer: no act/res
            o_ref[...] = y.astype(o_ref.dtype)

    # NOTE: padded hidden lanes may become 0.5 under sigmoid; this is harmless
    # only because padded weight ROWS are zero — keep the row zero-padding.


def _stream_layer_kernel(x_ref, w_ref, b_ref, o_ref, acc_ref, *,
                         activation, apply_act):
    """One Linear(+activation) with streamed weights: grid (M, N, K-reduction)."""
    k = pl.program_id(2)

    @pl.when(k == 0)
    def _():
        acc_ref[...] = jnp.zeros_like(acc_ref)

    acc_ref[...] += jnp.dot(x_ref[...], w_ref[...],
                            preferred_element_type=jnp.float32)

    @pl.when(k == pl.num_programs(2) - 1)
    def _():
        y = acc_ref[...] + b_ref[...].astype(jnp.float32)
        if apply_act:
            y = _apply_activation(y, activation)
        o_ref[...] = y.astype(o_ref.dtype)


# ------------------------------- MLP wrapper ---------------------------------

class MLPConfig:
    """Mirrors the fields of cfg.MODEL used by the PyTorch module."""

    def __init__(self, dim_out, num_stage, dim_hidden, num_hidden,
                 dim_hidden_fact, residual, activation, p_dropout=0.0):
        self.DIM_OUT = dim_out
        self.NUM_STAGE = num_stage
        self.DIM_HIDDEN = dim_hidden
        self.NUM_HIDDEN = num_hidden
        self.DIM_HIDDEN_FACT = dim_hidden_fact
        self.RESIDUAL = residual
        self.ACTIVATION = activation
        self.P_DROPOUT = p_dropout


class MLPPallas:
    def __init__(self, cfg: MLPConfig, input_size: int, key):
        dim_o = cfg.DIM_OUT
        num_s = cfg.NUM_STAGE
        dim_h = cfg.DIM_HIDDEN
        num_l = cfg.NUM_HIDDEN
        coef = cfg.DIM_HIDDEN_FACT
        self.residual = cfg.RESIDUAL
        self.activation = cfg.ACTIVATION

        self.h_size = [input_size]
        for _ in range(num_s):
            for _ in range(num_l):
                self.h_size.append(dim_h)
            dim_h = int(dim_h * coef)
        self.h_size.append(dim_o)

        # Deterministic init matching nn.Linear's U(-1/sqrt(fan_in), 1/sqrt(fan_in)).
        self.params = []
        for k in range(len(self.h_size) - 1):
            fan_in, fan_out = self.h_size[k], self.h_size[k + 1]
            key, wk, bk = jax.random.split(key, 3)
            bound = 1.0 / (fan_in ** 0.5)
            w = jax.random.uniform(wk, (fan_in, fan_out), jnp.float32, -bound, bound)
            b = jax.random.uniform(bk, (fan_out,), jnp.float32, -bound, bound)
            self.params.append((w, b))

        # Lane-dense (multiple-of-128) zero-padded params: weights bf16 (MXU),
        # biases f32 (VPU epilogue).  Row zero-padding is load-bearing (see note
        # in the fused kernel about sigmoid on padded lanes).
        self.padded_dims = [_round_up(d, 128) for d in self.h_size]
        self.packed = []
        for k, (w, b) in enumerate(self.params):
            kp, np_ = self.padded_dims[k], self.padded_dims[k + 1]
            w_p = (jnp.zeros((kp, np_), jnp.bfloat16)
                   .at[: w.shape[0], : w.shape[1]].set(w.astype(jnp.bfloat16)))
            b_p = jnp.zeros((1, np_), jnp.float32).at[0, : b.shape[0]].set(b)
            self.packed.append((w_p, b_p))

        self.residual_flags = tuple(
            self.residual and self.h_size[i] == self.h_size[i + 1]
            for i in range(len(self.params) - 1)
        )

        self.weight_bytes = sum(int(w.size) * 2 for w, _ in self.packed)   # bf16
        self.bias_bytes = sum(int(b.size) * 4 for _, b in self.packed)     # f32
        self.vmem_budget = _vmem_budget_bytes()
        # Fused (weight-resident) path only if padded weights comfortably fit
        # the per-core VMEM budget; otherwise stream weights layer by layer.
        self.needs_streaming = (
            self.weight_bytes + self.bias_bytes > int(self.vmem_budget * 0.6))

        # FeatureReversalNoise / CoupledGaussianDropout / Dropout are identity
        # at eval time and therefore omitted from the fused forward.
        # TODO(synk): training-mode stochastic noise layers are not implemented.

    # ---------------------------- tiling policy ------------------------------

    def _tile_bytes(self, tm, streaming):
        max_pd = max(self.padded_dims)
        if streaming:
            tk = min(max_pd, 512)
            tn = min(max_pd, 512)
            return (2 * tm * tk * 2 + 2 * tk * tn * 2 + 2 * tn * 4
                    + 2 * tm * tn * 4 + tm * tn * 4)
        in_tile = 2 * tm * self.padded_dims[0] * 2     # double-buffered bf16 x
        out_tile = 2 * tm * self.padded_dims[-1] * 4   # double-buffered f32 out
        act = 3 * tm * max_pd * 4                      # live f32 activation slabs
        return in_tile + out_tile + act

    def _choose_tm(self, M, streaming):
        M8 = _round_up(max(M, 1), 8)
        if M8 <= 128:
            tm = M8
        elif M8 <= 1024:
            # >=2 grid steps so both v7x TensorCores get work; tiles stay big
            # enough to keep the MXU fed on v5e/v6e as well.
            tm = _round_up((M8 + 1) // 2, 8)
        else:
            tm = 512
        resident = 0 if streaming else (self.weight_bytes + self.bias_bytes)
        while tm > 8 and resident + self._tile_bytes(tm, streaming) > self.vmem_budget:
            tm = max(8, _round_up(tm // 2, 8))
        return tm

    # ----------------------------- fused path --------------------------------

    def _forward_fused(self, x_p, tm):
        M_pad, K_pad = x_p.shape
        N_out_pad = self.padded_dims[-1]
        n_layers = len(self.packed)
        grid_m = M_pad // tm

        kernel = functools.partial(
            _fused_mlp_kernel,
            n_layers=n_layers,
            activation=self.activation,
            residual_flags=self.residual_flags,
        )

        # Weights/biases: whole-array, single-buffered, resident in VMEM.
        resident_spec = pl.BlockSpec(memory_space=pltpu.MemorySpace.VMEM)
        in_specs = [pl.BlockSpec((tm, K_pad), lambda i: (i, 0))]
        flat_params = []
        for w_p, b_p in self.packed:
            in_specs.append(resident_spec)
            in_specs.append(resident_spec)
            flat_params.extend([w_p, b_p])

        flops = 2 * M_pad * sum(int(w.shape[0]) * int(w.shape[1])
                                for w, _ in self.packed)
        transcendentals = (
            M_pad * sum(int(w.shape[1]) for w, _ in self.packed[:-1])
            if self.activation == "sigmoid" else 0
        )
        bytes_accessed = (x_p.size * 2 + self.weight_bytes + self.bias_bytes
                          + M_pad * N_out_pad * 4)

        vmem_limit = int(min(
            self.vmem_budget,
            max(self.weight_bytes + self.bias_bytes
                + self._tile_bytes(tm, streaming=False) + (4 << 20),
                32 << 20)))

        return pl.pallas_call(
            kernel,
            out_shape=jax.ShapeDtypeStruct((M_pad, N_out_pad), jnp.float32),
            grid=(grid_m,),
            in_specs=in_specs,
            out_specs=pl.BlockSpec((tm, N_out_pad), lambda i: (i, 0)),
            compiler_params=pltpu.CompilerParams(
                dimension_semantics=("parallel",),
                vmem_limit_bytes=vmem_limit,
            ),
            cost_estimate=pl.CostEstimate(
                flops=flops,
                transcendentals=transcendentals,
                bytes_accessed=bytes_accessed,
            ),
        )(x_p, *flat_params)

    # --------------------------- streaming path -------------------------------

    def _stream_layer(self, x_bf, w_p, b_p, tm, apply_act):
        M_pad = x_bf.shape[0]
        K_pad, N_pad = w_p.shape
        tk = _pick_tile(K_pad, 512)
        tn = _pick_tile(N_pad, 512)
        grid = (M_pad // tm, N_pad // tn, K_pad // tk)

        kernel = functools.partial(_stream_layer_kernel,
                                   activation=self.activation,
                                   apply_act=apply_act)

        tile_bytes = (2 * tm * tk * 2 + 2 * tk * tn * 2 + 2 * tn * 4
                      + 2 * tm * tn * 4 + tm * tn * 4)
        vmem_limit = int(min(self.vmem_budget,
                             max(tile_bytes + (4 << 20), 32 << 20)))

        return pl.pallas_call(
            kernel,
            out_shape=jax.ShapeDtypeStruct((M_pad, N_pad), jnp.float32),
            grid=grid,
            in_specs=[pl.BlockSpec((tm, tk), lambda i, j, k: (i, k)),
                      pl.BlockSpec((tk, tn), lambda i, j, k: (k, j)),
                      pl.BlockSpec((1, tn), lambda i, j, k: (0, j))],
            out_specs=pl.BlockSpec((tm, tn), lambda i, j, k: (i, j)),
            scratch_shapes=[pltpu.VMEM((tm, tn), jnp.float32)],
            compiler_params=pltpu.CompilerParams(
                dimension_semantics=("parallel", "parallel", "arbitrary"),
                vmem_limit_bytes=vmem_limit,
            ),
        )(x_bf, w_p, b_p)

    def _forward_streaming(self, x_p, tm):
        n_layers = len(self.packed)
        h_bf = x_p                                     # bf16 carry between layers
        out = None
        for l, (w_p, b_p) in enumerate(self.packed):
            is_last = (l == n_layers - 1)
            y = self._stream_layer(h_bf, w_p, b_p, tm, apply_act=not is_last)
            if is_last:
                out = y
            else:
                if self.residual_flags[l]:
                    # Residual add in the wrapper (f32) — acceptable for the
                    # large-model fallback path; precision matches the fused path.
                    y = y + h_bf.astype(jnp.float32)
                h_bf = y.astype(jnp.bfloat16)
        return out

    # -------------------------------- call ------------------------------------

    def __call__(self, x, force_streaming=False):
        M, K = x.shape
        assert K == self.h_size[0], (K, self.h_size[0])

        K_pad = self.padded_dims[0]
        N_out = self.h_size[-1]
        N_out_pad = self.padded_dims[-1]

        use_streaming = force_streaming or self.needs_streaming
        tm = self._choose_tm(M, streaming=use_streaming)
        M_pad = _round_up(M, tm)

        # bf16 input halves the HBM->VMEM DMA; only pad when actually needed.
        x_bf = x.astype(jnp.bfloat16)
        if M_pad == M and K_pad == K:
            x_p = x_bf
        else:
            x_p = jnp.zeros((M_pad, K_pad), jnp.bfloat16).at[:M, :K].set(x_bf)

        if use_streaming:
            out = self._forward_streaming(x_p, tm)
        else:
            out = self._forward_fused(x_p, tm)

        if M_pad == M and N_out_pad == N_out:
            return out
        return out[:M, :N_out]


# ---------------------------------- main -------------------------------------

if __name__ == "__main__":
    cfg = MLPConfig(
        dim_out=8,
        num_stage=1,
        dim_hidden=32,
        num_hidden=2,
        dim_hidden_fact=1.0,
        residual=True,
        activation="relu",
        p_dropout=0.1,
    )
    input_size = 32
    batch = 8

    key = jax.random.PRNGKey(0)
    key, pkey, xkey = jax.random.split(key, 3)

    model = MLPPallas(cfg, input_size=input_size, key=pkey)
    x = jax.random.normal(xkey, (batch, input_size), jnp.float32)

    out = jax.block_until_ready(model(x))

    # Pure-JAX reference of the eval-mode forward, mirroring the kernel's
    # precision path (bf16 weights + bf16 activation carry, f32 accumulate /
    # bias / activation / residual).
    h = x.astype(jnp.bfloat16)
    n_layers = len(model.params)
    for i in range(n_layers - 1):
        w, b = model.params[i]
        y = jnp.dot(h, w.astype(jnp.bfloat16),
                    preferred_element_type=jnp.float32) + b
        y = jnp.maximum(y, 0.0)
        if model.residual_flags[i]:
            y = y + h.astype(jnp.float32)
        h = y.astype(jnp.bfloat16)
    w, b = model.params[-1]
    ref = jnp.dot(h, w.astype(jnp.bfloat16),
                  preferred_element_type=jnp.float32) + b

    assert out.shape == (batch, cfg.DIM_OUT), out.shape
    assert jnp.allclose(out, ref, atol=1e-3, rtol=1e-3), "fused mismatch vs ref"

    # Also exercise the weight-streaming fallback (the path used when resident
    # padded weights would exceed the per-core VMEM budget, e.g. on v7x).
    out_stream = jax.block_until_ready(model(x, force_streaming=True))
    assert out_stream.shape == (batch, cfg.DIM_OUT), out_stream.shape
    assert jnp.allclose(out_stream, out, atol=1e-3, rtol=1e-3), \
        "streaming mismatch vs fused"

    print("KERNEL_OK")
</pallas_src>

<mosaic_0001>
module attributes {stable_mosaic.version = 11 : i64} {
  func.func @_fused_mlp_kernel(%arg0: i32, %arg1: memref<8x128xbf16, #tpu.memory_space<vmem>>, %arg2: memref<128x128xbf16, #tpu.memory_space<vmem>>, %arg3: memref<1x128xf32, #tpu.memory_space<vmem>>, %arg4: memref<128x128xbf16, #tpu.memory_space<vmem>>, %arg5: memref<1x128xf32, #tpu.memory_space<vmem>>, %arg6: memref<128x128xbf16, #tpu.memory_space<vmem>>, %arg7: memref<1x128xf32, #tpu.memory_space<vmem>>, %arg8: memref<8x128xf32, #tpu.memory_space<vmem>>) attributes {dimension_semantics = [#tpu.dimension_semantics<parallel>], iteration_bounds = array<i64: 1>, scalar_prefetch = 0 : i64, scratch_operands = 0 : i64, tpu.core_type = #tpu.core_type<tc>, window_params = [{transform_indices = @transform_0, window_bounds = array<i64: 8, 128>}, {pipeline_mode = #tpu.pipeline_mode<synchronous>, transform_indices = @transform_1, window_bounds = array<i64: 128, 128>}, {pipeline_mode = #tpu.pipeline_mode<synchronous>, transform_indices = @transform_2, window_bounds = array<i64: 1, 128>}, {pipeline_mode = #tpu.pipeline_mode<synchronous>, transform_indices = @transform_3, window_bounds = array<i64: 128, 128>}, {pipeline_mode = #tpu.pipeline_mode<synchronous>, transform_indices = @transform_4, window_bounds = array<i64: 1, 128>}, {pipeline_mode = #tpu.pipeline_mode<synchronous>, transform_indices = @transform_5, window_bounds = array<i64: 128, 128>}, {pipeline_mode = #tpu.pipeline_mode<synchronous>, transform_indices = @transform_6, window_bounds = array<i64: 1, 128>}, {transform_indices = @transform_7, window_bounds = array<i64: 8, 128>}]} {
    %c0 = arith.constant 0 : index
    %c0_0 = arith.constant 0 : index
    %0 = vector.load %arg1[%c0, %c0_0] : memref<8x128xbf16, #tpu.memory_space<vmem>>, vector<8x128xbf16>
    %c0_1 = arith.constant 0 : index
    %c0_2 = arith.constant 0 : index
    %1 = vector.load %arg2[%c0_1, %c0_2] : memref<128x128xbf16, #tpu.memory_space<vmem>>, vector<128x128xbf16>
    %c0_3 = arith.constant 0 : index
    %c0_4 = arith.constant 0 : index
    %2 = vector.load %arg3[%c0_3, %c0_4] : memref<1x128xf32, #tpu.memory_space<vmem>>, vector<1x128xf32>
    %cst = arith.constant dense<0.000000e+00> : vector<8x128xf32>
    %3 = tpu.matmul %0, %1, %cst {dimension_numbers = #tpu.dot_dimension_numbers<[1], [0], [0], [1], [0, 0, 1, 1], [], []>} : vector<8x128xbf16>, vector<128x128xbf16>, vector<8x128xf32> -> vector<8x128xf32>
    %4 = vector.broadcast %2 : vector<1x128xf32> to vector<8x128xf32>
    %5 = arith.addf %3, %4 : vector<8x128xf32>
    %cst_5 = arith.constant 0.000000e+00 : f32
    %6 = vector.broadcast %cst_5 : f32 to vector<8x128xf32>
    %7 = arith.maximumf %5, %6 : vector<8x128xf32>
    %8 = arith.extf %0 : vector<8x128xbf16> to vector<8x128xf32>
    %9 = arith.addf %7, %8 : vector<8x128xf32>
    %10 = arith.truncf %9 : vector<8x128xf32> to vector<8x128xbf16>
    %c0_6 = arith.constant 0 : index
    %c0_7 = arith.constant 0 : index
    %11 = vector.load %arg4[%c0_6, %c0_7] : memref<128x128xbf16, #tpu.memory_space<vmem>>, vector<128x128xbf16>
    %c0_8 = arith.constant 0 : index
    %c0_9 = arith.constant 0 : index
    %12 = vector.load %arg5[%c0_8, %c0_9] : memref<1x128xf32, #tpu.memory_space<vmem>>, vector<1x128xf32>
    %cst_10 = arith.constant dense<0.000000e+00> : vector<8x128xf32>
    %13 = tpu.matmul %10, %11, %cst_10 {dimension_numbers = #tpu.dot_dimension_numbers<[1], [0], [0], [1], [0, 0, 1, 1], [], []>} : vector<8x128xbf16>, vector<128x128xbf16>, vector<8x128xf32> -> vector<8x128xf32>
    %14 = vector.broadcast %12 : vector<1x128xf32> to vector<8x128xf32>
    %15 = arith.addf %13, %14 : vector<8x128xf32>
    %cst_11 = arith.constant 0.000000e+00 : f32
    %16 = vector.broadcast %cst_11 : f32 to vector<8x128xf32>
    %17 = arith.maximumf %15, %16 : vector<8x128xf32>
    %18 = arith.extf %10 : vector<8x128xbf16> to vector<8x128xf32>
    %19 = arith.addf %17, %18 : vector<8x128xf32>
    %20 = arith.truncf %19 : vector<8x128xf32> to vector<8x128xbf16>
    %c0_12 = arith.constant 0 : index
    %c0_13 = arith.constant 0 : index
    %21 = vector.load %arg6[%c0_12, %c0_13] : memref<128x128xbf16, #tpu.memory_space<vmem>>, vector<128x128xbf16>
    %c0_14 = arith.constant 0 : index
    %c0_15 = arith.constant 0 : index
    %22 = vector.load %arg7[%c0_14, %c0_15] : memref<1x128xf32, #tpu.memory_space<vmem>>, vector<1x128xf32>
    %cst_16 = arith.constant dense<0.000000e+00> : vector<8x128xf32>
    %23 = tpu.matmul %20, %21, %cst_16 {dimension_numbers = #tpu.dot_dimension_numbers<[1], [0], [0], [1], [0, 0, 1, 1], [], []>} : vector<8x128xbf16>, vector<128x128xbf16>, vector<8x128xf32> -> vector<8x128xf32>
    %24 = vector.broadcast %22 : vector<1x128xf32> to vector<8x128xf32>
    %25 = arith.addf %23, %24 : vector<8x128xf32>
    %c0_17 = arith.constant 0 : index
    %c0_18 = arith.constant 0 : index
    %26 = vector.load %arg8[%c0_17, %c0_18] : memref<8x128xf32, #tpu.memory_space<vmem>>, vector<8x128xf32>
    tpu.vector_store %arg8[%c0_17, %c0_18], %25 {strides = array<i32>} : memref<8x128xf32, #tpu.memory_space<vmem>>, vector<8x128xf32>,
    return
  }
  func.func @transform_0(%arg0: i32) -> (i32, i32) {
    %c0_i32 = arith.constant 0 : i32
    %c0_i32_0 = arith.constant 0 : i32
    return %arg0, %c0_i32 : i32, i32
  }
  func.func @transform_1(%arg0: i32) -> (i32, i32) {
    %c0_i32 = arith.constant 0 : i32
    %c0_i32_0 = arith.constant 0 : i32
    %c0_i32_1 = arith.constant 0 : i32
    return %c0_i32, %c0_i32_0 : i32, i32
  }
  func.func @transform_2(%arg0: i32) -> (i32, i32) {
    %c0_i32 = arith.constant 0 : i32
    %c0_i32_0 = arith.constant 0 : i32
    %c0_i32_1 = arith.constant 0 : i32
    return %c0_i32, %c0_i32_0 : i32, i32
  }
  func.func @transform_3(%arg0: i32) -> (i32, i32) {
    %c0_i32 = arith.constant 0 : i32
    %c0_i32_0 = arith.constant 0 : i32
    %c0_i32_1 = arith.constant 0 : i32
    return %c0_i32, %c0_i32_0 : i32, i32
  }
  func.func @transform_4(%arg0: i32) -> (i32, i32) {
    %c0_i32 = arith.constant 0 : i32
    %c0_i32_0 = arith.constant 0 : i32
    %c0_i32_1 = arith.constant 0 : i32
    return %c0_i32, %c0_i32_0 : i32, i32
  }
  func.func @transform_5(%arg0: i32) -> (i32, i32) {
    %c0_i32 = arith.constant 0 : i32
    %c0_i32_0 = arith.constant 0 : i32
    %c0_i32_1 = arith.constant 0 : i32
    return %c0_i32, %c0_i32_0 : i32, i32
  }
  func.func @transform_6(%arg0: i32) -> (i32, i32) {
    %c0_i32 = arith.constant 0 : i32
    %c0_i32_0 = arith.constant 0 : i32
    %c0_i32_1 = arith.constant 0 : i32
    return %c0_i32, %c0_i32_0 : i32, i32
  }
  func.func @transform_7(%arg0: i32) -> (i32, i32) {
    %c0_i32 = arith.constant 0 : i32
    %c0_i32_0 = arith.constant 0 : i32
    return %arg0, %c0_i32 : i32, i32
  }
}

</mosaic_0001>

<bundles_post_ra>
// kernel: tpu_custom_call.1
= control target key start
LH: loop header
LB: loop body
LE: loop exit
PB: predicated region body
PF: predicated region fallthrough
CT: control target
= control target key end

     0   :  { %12 = vsyncpa [#allocation3], 0  ;;  %s863_s0 = inlined_call_operand.hbm [shape: bf16[8,128], index: 0, kind: input, shape index: {}]   ;;  %s864_s1 = inlined_call_operand.hbm [shape: bf16[128,128], index: 1, kind: input, shape index: {}]   ;;  %s865_s2 = inlined_call_operand.vmem [shape: f32[1,128], index: 2, kind: input, shape index: {}]   ;;  %s866_s3 = inlined_call_operand.hbm [shape: bf16[128,128], index: 3, kind: input, shape index: {}]   ;;  %s867_s4 = inlined_call_operand.vmem [shape: f32[1,128], index: 4, kind: input, shape index: {}]   ;;  %s868_s5 = inlined_call_operand.hbm [shape: bf16[128,128], index: 5, kind: input, shape index: {}]   ;;  %s869_s6 = inlined_call_operand.vmem [shape: f32[1,128], index: 6, kind: input, shape index: {}]   ;;  %s870_s7 = inlined_call_operand.hbm [shape: f32[8,128], index: 7, kind: output, shape index: {}]  }
   0x1   :  { %13 = vsyncpa [#allocation6], 0 }
   0x2   :  { %14 = vsyncpa [#allocation9], 0 }
   0x3   :  { %15 = vsyncpa [#allocation4], 0  ;;  %s706_s24 = smov [#allocation5]   ;;  %s588_s28 = scalar_lea.hbm %s864_s1, 1024 }
   0x4   :  { %s31_s25 = sshll.u32 %s706_s24, 4  ;;  %p589_p0 = scmp.ne.s32.totalorder %s864_s1, %s588_s28  ;;  %s32_s25 = int_to_ptr.vmem [resolvable:$true] %s31_s25 }
   0x5   :  { %p592_p1 = scmp.lt.u32.totalorder %s588_s28, %s864_s1 }
   0x7   :  { %p594_p2 = pnand %p592_p1, %p589_p0 }
   0x9   :  { %597 = shalt.err (!%p594_p2)
}
   0xa   :  { %s598_s10 = scalar_lea.vmem %s32_s25, 1024  ;;  %p603_p4 = scmp.lt.s32.totalorder %s32_s25, %s32_s25 }
   0xb   :  { %p599_p3 = scmp.ne.s32.totalorder %s32_s25, %s598_s10  ;;  %p604_p5 = scmp.lt.s32.totalorder %s598_s10, %s598_s10 }
   0xd   :  { %p605_p6 = por %p604_p5, %p603_p4 }
   0xf   :  { %p606_p7 = pnand %p605_p6, %p599_p3 }
  0x11   :  { %609 = shalt.err (!%p606_p7)
}
  0x12   :  { %s707_s11 = smov 64   ;;  %s708_s12 = smov 4  }
  0x13   :  { %37 = dma.hbm_to_vmem [thread:$0]  %s864_s1, 1024, %s32_s25, [#allocation6], %s707_s11, %s707_s11, %s708_s12  }
  0x14   :  { %s709_s15 = smov [#allocation2]   ;;  %s710_s17 = smov [#allocation7]  }
  0x15   :  { %s22_s16 = sshll.u32 %s709_s15, 4  ;;  %s45_s18 = sshll.u32 %s710_s17, 4  ;;  %s23_s16 = int_to_ptr.vmem [resolvable:$true] %s22_s16  ;;  %s46_s18 = int_to_ptr.vmem [resolvable:$true] %s45_s18 }
  0x16   :  { %s610_s21 = scalar_lea.hbm %s863_s0, 64 }
  0x17   :  { %p611_p8 = scmp.ne.s32.totalorder %s863_s0, %s610_s21  ;;  %p614_p9 = scmp.lt.u32.totalorder %s610_s21, %s863_s0 }
  0x19   :  { %p616_p10 = pnand %p614_p9, %p611_p8 }
  0x1b   :  { %619 = shalt.err (!%p616_p10)
}
  0x1c   :  { %s620_s1 = scalar_lea.vmem %s23_s16, 64  ;;  %p625_p12 = scmp.lt.s32.totalorder %s23_s16, %s23_s16 }
  0x1d   :  { %p621_p11 = scmp.ne.s32.totalorder %s23_s16, %s620_s1  ;;  %p626_p13 = scmp.lt.s32.totalorder %s620_s1, %s620_s1 }
  0x1f   :  { %p627_p0 = por %p626_p13, %p625_p12 }
  0x21   :  { %p628_p1 = pnand %p627_p0, %p621_p11 }
  0x23   :  { %631 = shalt.err (!%p628_p1)
}
  0x24   :  { %25 = dma.hbm_to_vmem [thread:$0]  %s863_s0, 64, %s23_s16, [#allocation3]  }
  0x25   :  { %s632_s30 = scalar_lea.hbm %s866_s3, 1024 }
  0x26   :  { %p633_p2 = scmp.ne.s32.totalorder %s866_s3, %s632_s30  ;;  %p636_p3 = scmp.lt.u32.totalorder %s632_s30, %s866_s3 }
  0x28   :  { %p638_p4 = pnand %p636_p3, %p633_p2 }
  0x2a   :  { %641 = shalt.err (!%p638_p4)
}
  0x2b   :  { %s642_s14 = scalar_lea.vmem %s46_s18, 1024  ;;  %p647_p6 = scmp.lt.s32.totalorder %s46_s18, %s46_s18 }
  0x2c   :  { %p643_p5 = scmp.ne.s32.totalorder %s46_s18, %s642_s14  ;;  %p648_p7 = scmp.lt.s32.totalorder %s642_s14, %s642_s14 }
  0x2e   :  { %p649_p8 = por %p648_p7, %p647_p6 }
  0x30   :  { %p650_p9 = pnand %p649_p8, %p643_p5 }
  0x32   :  { %653 = shalt.err (!%p650_p9)
}
  0x33   :  { %51 = dma.hbm_to_vmem [thread:$0]  %s866_s3, 1024, %s46_s18, [#allocation6], %s707_s11, %s707_s11, %s708_s12  }
  0x34   :  { %s711_s16 = smov [#allocation8]   ;;  %s654_s21 = scalar_lea.hbm %s868_s5, 1024 }
  0x35   :  { %s59_s17 = sshll.u32 %s711_s16, 4  ;;  %p655_p10 = scmp.ne.s32.totalorder %s868_s5, %s654_s21  ;;  %s60_s17 = int_to_ptr.vmem [resolvable:$true] %s59_s17 }
  0x36   :  { %p658_p11 = scmp.lt.u32.totalorder %s654_s21, %s868_s5 }
  0x38   :  { %p660_p12 = pnand %p658_p11, %p655_p10 }
  0x3a   :  { %663 = shalt.err (!%p660_p12)
}
  0x3b   :  { %s664_s1 = scalar_lea.vmem %s60_s17, 1024  ;;  %p669_p0 = scmp.lt.s32.totalorder %s60_s17, %s60_s17 }
  0x3c   :  { %p665_p13 = scmp.ne.s32.totalorder %s60_s17, %s664_s1  ;;  %p670_p1 = scmp.lt.s32.totalorder %s664_s1, %s664_s1 }
  0x3e   :  { %p671_p2 = por %p670_p1, %p669_p0 }
  0x40   :  { %p672_p3 = pnand %p671_p2, %p665_p13 }
  0x42   :  { %675 = shalt.err (!%p672_p3)
}
  0x43   :  { %65 = dma.hbm_to_vmem [thread:$0]  %s868_s5, 1024, %s60_s17, [#allocation9], %s707_s11, %s707_s11, %s708_s12  }
  0x44   :  { %698 = dma.done.wait [#allocation3], 64  }
  0x45   :  { %699 = vsyncadd [#allocation3], 4294967232 }
  0x46   :  { %700 = dma.done.wait [#allocation6], 2048  }
  0x47   :  { %701 = vsyncadd [#allocation6], 4294965248 }
  0x48   :  { %702 = dma.done.wait [#allocation9], 1024  }
  0x49   :  { %703 = vsyncadd [#allocation9], 4294966272  ;;  %v712_v0 = vmov 0.0   ;;  %vm713_vm0 = vmmov 0   ;;  %v564_v1 = vld [vmem:[#allocation5] sm:$0xff]   ;;  %v565_v2 = vld [vmem:[#allocation5 + $0x8] sm:$0xff]  }
  0x4a   :  { %495 = vmatprep.subr.bf16.mxu0 %v712_v0  ;;  %511 = vmatprep.mubr.msk.bf16.mxu0 %vm713_vm0, %v712_v0  ;;  %v566_v3 = vld [vmem:[#allocation5 + $0x10] sm:$0xff]   ;;  %v572_v4 = vld [vmem:[#allocation7] sm:$0xff]   ;;  %v567_v5 = vld [vmem:[#allocation5 + $0x18] sm:$0xff]   ;;  %s714_s28 = smov [#allocation10]  }
  0x4b   :  { %515 = vmatprep.subr.bf16.mxu1 %v712_v0  ;;  %531 = vmatprep.mubr.msk.bf16.mxu1 %vm713_vm0, %v712_v0  ;;  %v573_v6 = vld [vmem:[#allocation7 + $0x8] sm:$0xff]   ;;  %v568_v7 = vld [vmem:[#allocation5 + $0x20] sm:$0xff]   ;;  %v574_v8 = vld [vmem:[#allocation7 + $0x10] sm:$0xff]   ;;  %s430_s29 = sshll.u32 %s714_s28, 4  ;;  %s431_s29 = int_to_ptr.vmem [resolvable:$true] %s430_s29 }
  0x4c   :  { %496 = vmatpush3.bf16.msra.mxu0 %v564_v1  ;;  %516 = vmatpush3.bf16.msra.mxu1 %v572_v4  ;;  %v569_v9 = vld [vmem:[#allocation5 + $0x28] sm:$0xff]   ;;  %v575_v10 = vld [vmem:[#allocation7 + $0x18] sm:$0xff]   ;;  %v570_v11 = vld [vmem:[#allocation5 + $0x30] sm:$0xff]   ;;  %p681_p5 = scmp.lt.s32.totalorder %s431_s29, %s431_s29 }
  0x4d   :  { %497 = vmatprep.subr.bf16.mxu0 %v712_v0  ;;  %517 = vmatprep.subr.bf16.mxu1 %v712_v0  ;;  %v576_v12 = vld [vmem:[#allocation7 + $0x20] sm:$0xff]   ;;  %v571_v13 = vld [vmem:[#allocation5 + $0x38] sm:$0xff]   ;;  %v577_v14 = vld [vmem:[#allocation7 + $0x28] sm:$0xff]  }
  0x4e   :  { %v81_v15 = vld [vmem:[#allocation2] sm:$0xf]  ;;  %v578_v16 = vld [vmem:[#allocation7 + $0x30] sm:$0xff]   ;;  %v580_v18 = vld [vmem:[#allocation8] sm:$0xff]  }
  0x4f   :  { %v579_v17 = vld [vmem:[#allocation7 + $0x38] sm:$0xff]   ;;  %v581_v19 = vld [vmem:[#allocation8 + $0x8] sm:$0xff]   ;;  %v582_v20 = vld [vmem:[#allocation8 + $0x10] sm:$0xff]   ;;  %v194_v26 = vunpack.c.l.bf16 %v81_v15 }
  0x50   :  { %498 = vmatpush3.bf16.msra.mxu0 %v565_v2  ;;  %518 = vmatpush3.bf16.msra.mxu1 %v573_v6  ;;  %v583_v21 = vld [vmem:[#allocation8 + $0x18] sm:$0xff]   ;;  %v584_v22 = vld [vmem:[#allocation8 + $0x20] sm:$0xff]   ;;  %v585_v23 = vld [vmem:[#allocation8 + $0x28] sm:$0xff]  }
  0x51   :  { %499 = vmatprep.subr.bf16.mxu0 %v712_v0  ;;  %519 = vmatprep.subr.bf16.mxu1 %v712_v0  ;;  %v441_v24 = vld [vmem:[%s865_s2] ss:$0 sm:$0xff]  ;;  %v586_v34 = vld [vmem:[#allocation8 + $0x30] sm:$0xff]  }
  0x52   :  { %v587_v35 = vld [vmem:[#allocation8 + $0x38] sm:$0xff]  }
  0x53   :  { %v450_v36 = vld [vmem:[%s867_s4] ss:$0 sm:$0xff]  ;;  %s676_s4 = scalar_lea.vmem %s431_s29, 128 }
  0x54   :  { %500 = vmatpush3.bf16.msra.mxu0 %v566_v3  ;;  %520 = vmatpush3.bf16.msra.mxu1 %v574_v8  ;;  %v459_v46 = vld [vmem:[%s869_s6] ss:$0 sm:$0xff]  ;;  %p677_p4 = scmp.ne.s32.totalorder %s431_s29, %s676_s4  ;;  %p682_p6 = scmp.lt.s32.totalorder %s676_s4, %s676_s4 }
  0x55   :  { %501 = vmatprep.subr.bf16.mxu0 %v712_v0  ;;  %521 = vmatprep.subr.bf16.mxu1 %v712_v0 }
  0x56   :  { %p683_p7 = por %p682_p6, %p681_p5 }
  0x58   :  { %502 = vmatpush3.bf16.msra.mxu0 %v567_v5  ;;  %522 = vmatpush3.bf16.msra.mxu1 %v575_v10  ;;  %p684_p8 = pnand %p683_p7, %p677_p4 }
  0x59   :  { %503 = vmatprep.subr.bf16.mxu0 %v712_v0  ;;  %523 = vmatprep.subr.bf16.mxu1 %v712_v0 }
  0x5c   :  { %504 = vmatpush3.bf16.msra.mxu0 %v568_v7  ;;  %524 = vmatpush3.bf16.msra.mxu1 %v576_v12 }
  0x5d   :  { %505 = vmatprep.subr.bf16.mxu0 %v712_v0  ;;  %525 = vmatprep.subr.bf16.mxu1 %v712_v0 }
  0x60   :  { %506 = vmatpush3.bf16.msra.mxu0 %v569_v9  ;;  %526 = vmatpush3.bf16.msra.mxu1 %v577_v14 }
  0x61   :  { %507 = vmatprep.subr.bf16.mxu0 %v712_v0  ;;  %527 = vmatprep.subr.bf16.mxu1 %v712_v0 }
  0x64   :  { %508 = vmatpush3.bf16.msra.mxu0 %v570_v11  ;;  %528 = vmatpush3.bf16.msra.mxu1 %v578_v16 }
  0x65   :  { %509 = vmatprep.subr.bf16.mxu0 %v712_v0  ;;  %529 = vmatprep.subr.bf16.mxu1 %v712_v0 }
  0x68   :  { %510 = vmatpush3.bf16.msra.mxu0 %v571_v13  ;;  %530 = vmatpush3.bf16.msra.mxu1 %v579_v17 }
  0x69   :  { %535 = vmatprep.subr.bf16.mxu0 %v712_v0 }
  0x6b   :  { %512 = vmatmul.mubr.bf16.vlgmr.msra.gmra.mrb[0].mxu0 %v81_v15 }
  0x6c   :  { %551 = vmatprep.mubr.msk.bf16.mxu0 %vm713_vm0, %v712_v0  ;;  %536 = vmatpush3.bf16.msra.mxu0 %v580_v18 }
  0x6d   :  { %537 = vmatprep.subr.bf16.mxu0 %v712_v0 }
  0x70   :  { %538 = vmatpush3.bf16.msra.mxu0 %v581_v19 }
  0x71   :  { %539 = vmatprep.subr.bf16.mxu0 %v712_v0 }
  0x74   :  { %540 = vmatpush3.bf16.msra.mxu0 %v582_v20 }
  0x75   :  { %541 = vmatprep.subr.bf16.mxu0 %v712_v0 }
  0x78   :  { %542 = vmatpush3.bf16.msra.mxu0 %v583_v21 }
  0x79   :  { %543 = vmatprep.subr.bf16.mxu0 %v712_v0 }
  0x7c   :  { %544 = vmatpush3.bf16.msra.mxu0 %v584_v22 }
  0x7d   :  { %545 = vmatprep.subr.bf16.mxu0 %v712_v0 }
  0x80   :  { %546 = vmatpush3.bf16.msra.mxu0 %v585_v23 }
  0x81   :  { %547 = vmatprep.subr.bf16.mxu0 %v712_v0 }
  0x84   :  { %548 = vmatpush3.bf16.msra.mxu0 %v586_v34 }
  0x85   :  { %549 = vmatprep.subr.bf16.mxu0 %v712_v0 }
  0x88   :  { %550 = vmatpush3.bf16.msra.mxu0 %v587_v35 }
 0x13e   :  { %v187_v25 = vpop.f32.mrb[0].mxu0 }
 0x13f   :  { %v188_v27 = vadd.f32 %v441_v24, %v187_v25  ;;  %v513_v28 = vpop.f32.mrb[1].mxu0 }
 0x140   :  { %v190_v29 = vpop.f32.mrb[2].mxu0 }
 0x141   :  { %v193_v30 = vmax.f32 %v188_v27, 0.0  ;;  %v514_v31 = vpop.f32.mrb[3].mxu0 }
 0x143   :  { %v195_v32 = vadd.f32 %v194_v26, %v193_v30 }
 0x145   :  { %v196_v33 = vpack.c.bf16 %v195_v32, %v195_v32 }
 0x147   :  { %532 = vmatmul.mubr.bf16.vlgmr.msra.gmra.mrb[0].mxu1 %v196_v33  ;;  %v309_v42 = vunpack.c.l.bf16 %v196_v33 }
 0x21a   :  { %v302_v37 = vpop.f32.mrb[0].mxu1 }
 0x21b   :  { %v303_v38 = vadd.f32 %v450_v36, %v302_v37  ;;  %v533_v39 = vpop.f32.mrb[1].mxu1 }
 0x21c   :  { %v305_v40 = vpop.f32.mrb[2].mxu1 }
 0x21d   :  { %v308_v41 = vmax.f32 %v303_v38, 0.0  ;;  %v534_v43 = vpop.f32.mrb[3].mxu1 }
 0x21f   :  { %v310_v44 = vadd.f32 %v309_v42, %v308_v41 }
 0x221   :  { %v311_v45 = vpack.c.bf16 %v310_v44, %v310_v44 }
 0x223   :  { %552 = vmatmul.mubr.bf16.vlgmr.msra.gmra.mrb[4].mxu0 %v311_v45 }
 0x2f6   :  { %v417_v47 = vpop.f32.mrb[4].mxu0 }
 0x2f7   :  { %v418_v48 = vadd.f32 %v459_v46, %v417_v47  ;;  %v553_v49 = vpop.f32.mrb[5].mxu0 }
 0x2f8   :  { %v420_v50 = vpop.f32.mrb[6].mxu0 }
 0x2f9   :  { %423 = vst [vmem:[#allocation10] sm:$0xff] %v418_v48  ;;  %v554_v51 = vpop.f32.mrb[7].mxu0 }
 0x2fa   :  { %687 = shalt.err (!%p684_p8)
}
 0x2fb   :  { %s688_s6 = scalar_lea.hbm %s870_s7, 128 }
 0x2fc   :  { %p689_p9 = scmp.ne.s32.totalorder %s870_s7, %s688_s6  ;;  %p692_p10 = scmp.lt.u32.totalorder %s688_s6, %s870_s7 }
 0x2fe   :  { %p694_p11 = pnand %p692_p10, %p689_p9 }
 0x300   :  { %697 = shalt.err (!%p694_p11)
}
 0x301   :  { %433 = dma.vmem_to_hbm [thread:$0]  %s431_s29, 128, %s870_s7, [#allocation4]  }
 0x302   :  { %704 = dma.done.wait [#allocation4], 128  }
 0x303   :  { %705 = vsyncadd [#allocation4], 4294967168 }
 0x304   :  { %437 = vsyncpa [#allocation3], 1 }
 0x305   :  { %438 = vsyncpa [#allocation6], 1 }
 0x306   :  { %439 = vsyncpa [#allocation9], 1 }
 0x307   :  { %440 = vsyncpa [#allocation4], 1 }

</bundles_post_ra>
